<compile_context>
chip_gen: v5e
topology: v5e:2x2
jax: 0.10.0
libtpu: 0.0.40
codegen_flags: <defaults>
</compile_context>

<pallas_src>
import numpy as np
import jax
import jax.numpy as jnp
from jax.experimental import pallas as pl
from jax.experimental.pallas import tpu as pltpu

# Problem sizes implied by the module (small demo shapes).
N = 2
H = W = 16
C_IN, C_MID, C_OUT = 3, 16, 32
H2 = W2 = (H + 2 * 1 - 3) // 2 + 1          # = 8  (stride-2 conv output)

XIN_ROWS, XIN_COLS = N * H, W * C_IN         # (32, 48)
Y_COLS = W * C_MID                           # 256
OUT_ROWS, OUT_COLS = N * H2, W2 * C_OUT      # (16, 256)


# ----------------------------------------------------------------------------
# Fused encoder kernel (single grid-less invocation, whole batch).
#   xin_ref  : (32, 48)    input, rows=(n,h), lanes=(w,cin)
#   tsh_ref  : (2, 32, 32) 0/1 row-shift matrices for conv1 taps kh=0 / kh=2
#   w1_ref   : (3, 48, 256) conv1 weights, kw taps + horiz. pad folded in
#   b1_ref   : (1, 256)    conv1 bias tiled over w
#   ssel_ref : (3, 16, 32) 0/1 stride-2 row-selection matrices (conv2 kh taps)
#   w2_ref   : (768, 256)  conv2 weights, kw taps + horiz. pad folded in
#   b2_ref   : (1, 256)    conv2 bias tiled over ow
#   o_ref    : (16, 256)   output, rows=(n,oh), lanes=(ow,c_out)
# ----------------------------------------------------------------------------
def fused_encoder_kernel(xin_ref, tsh_ref, w1_ref, b1_ref, ssel_ref,
                         w2_ref, b2_ref, o_ref):
    f32 = jnp.float32
    xin = xin_ref[...]                                             # (32, 48)

    # conv1: kh = 0 / 2 taps read rows h-1 / h+1 -> exact 0/1 row-shift
    # matmuls (vertical zero padding handled by the zeroed rows).
    x_m1 = jnp.dot(tsh_ref[0], xin, preferred_element_type=f32)    # rows h-1
    x_p1 = jnp.dot(tsh_ref[1], xin, preferred_element_type=f32)    # rows h+1

    # kw taps + horizontal padding live inside the (48, 256) weight blocks.
    y = jnp.dot(x_m1, w1_ref[0], preferred_element_type=f32)
    y = y + jnp.dot(xin,  w1_ref[1], preferred_element_type=f32)
    y = y + jnp.dot(x_p1, w1_ref[2], preferred_element_type=f32)
    y = jnp.maximum(y + b1_ref[...], 0.0)                          # (32, 256)

    # conv2 (stride 2): per-kh stride-2 row selection via 0/1 matmuls, then a
    # single wide-K contraction against the block-banded conv2 weights.
    y0 = jnp.dot(ssel_ref[0], y, preferred_element_type=f32)       # (16, 256)
    y1 = jnp.dot(ssel_ref[1], y, preferred_element_type=f32)
    y2 = jnp.dot(ssel_ref[2], y, preferred_element_type=f32)
    ycat = jnp.concatenate([y0, y1, y2], axis=1)                    # (16, 768)
    z = jnp.dot(ycat, w2_ref[...], preferred_element_type=f32)      # (16, 256)
    o_ref[...] = jnp.maximum(z + b2_ref[...], 0.0)                  # lane-dense store


# ----------------------------------------------------------------------------
# One-time parameter / constant preparation (kept off the per-call data path).
# ----------------------------------------------------------------------------
def prepare_params(params):
    w1, b1, w2, b2 = params                      # HWIO weights

    # kw selector for conv1 (stride 1, pad 1): kwsel1[kw, w_in, w_out] = 1
    # iff w_in == w_out + kw - 1 (both in range)  -> horizontal pad for free.
    kwsel1 = np.zeros((3, W, W), np.float32)
    for kw in range(3):
        for w_out in range(W):
            w_in = w_out + kw - 1
            if 0 <= w_in < W:
                kwsel1[kw, w_in, w_out] = 1.0

    # kw selector for conv2 (stride 2, pad 1): kwsel2[kw, w_in, ow] = 1
    # iff w_in == 2*ow + kw - 1 (in range).
    kwsel2 = np.zeros((3, W, W2), np.float32)
    for kw in range(3):
        for ow in range(W2):
            w_in = 2 * ow + kw - 1
            if 0 <= w_in < W:
                kwsel2[kw, w_in, ow] = 1.0

    # Block-banded weights: rows=(w_in, c_in[/c_mid]), cols=(w_out[/ow], c_out)
    w1blk = jnp.einsum('kuw,hkci->hucwi', kwsel1, w1).reshape(3, XIN_COLS, Y_COLS)
    w2cat = jnp.einsum('kwv,hkio->hwivo', kwsel2, w2).reshape(3 * Y_COLS, OUT_COLS)

    b1row = jnp.tile(b1, W).reshape(1, Y_COLS)       # (1, 256): lane (w, c_mid)
    b2row = jnp.tile(b2, W2).reshape(1, OUT_COLS)    # (1, 256): lane (ow, c_out)

    # Row-shift matrices for conv1 taps kh=0 (h-1) and kh=2 (h+1); block
    # diagonal over the batch so rows never leak across images.
    tsh = np.zeros((2, XIN_ROWS, XIN_ROWS), np.float32)
    for idx, kh in enumerate((0, 2)):
        for n in range(N):
            for h in range(H):
                hp = h + kh - 1
                if 0 <= hp < H:
                    tsh[idx, n * H + h, n * H + hp] = 1.0

    # Stride-2 row-selection matrices for conv2 taps kh = 0, 1, 2.
    ssel = np.zeros((3, OUT_ROWS, XIN_ROWS), np.float32)
    for kh in range(3):
        for n in range(N):
            for oh in range(H2):
                h = 2 * oh + kh - 1
                if 0 <= h < H:
                    ssel[kh, n * H2 + oh, n * H + h] = 1.0

    return (jnp.asarray(tsh), w1blk, b1row, jnp.asarray(ssel), w2cat, b2row)


# ----------------------------------------------------------------------------
# Full Encoder forward (NCHW in, NCHW out — matches PyTorch semantics).
# Data-path XLA glue: one transpose+reshape in, one reshape+transpose out.
# ----------------------------------------------------------------------------
def encoder_forward(x_nchw, kparams):
    tsh, w1blk, b1row, ssel, w2cat, b2row = kparams

    xin = jnp.transpose(x_nchw, (0, 2, 3, 1)).reshape(XIN_ROWS, XIN_COLS)

    out = pl.pallas_call(
        fused_encoder_kernel,
        out_shape=jax.ShapeDtypeStruct((OUT_ROWS, OUT_COLS), jnp.float32),
        in_specs=[pl.BlockSpec(memory_space=pltpu.MemorySpace.VMEM)] * 7,
        out_specs=pl.BlockSpec(memory_space=pltpu.MemorySpace.VMEM),
    )(xin, tsh, w1blk, b1row, ssel, w2cat, b2row)

    z = out.reshape(N, H2, W2, C_OUT)            # rows=(n,oh), lanes=(ow,co)
    return jnp.transpose(z, (0, 3, 1, 2))        # NCHW


# Pure-JAX reference (lax convolution) for correctness checking.
def encoder_reference(x_nchw, params):
    w1, b1, w2, b2 = params
    x = jnp.transpose(x_nchw, (0, 2, 3, 1))
    y = jax.lax.conv_general_dilated(
        x, w1, (1, 1), [(1, 1), (1, 1)],
        dimension_numbers=("NHWC", "HWIO", "NHWC"),
        precision=jax.lax.Precision.HIGHEST)
    y = jax.nn.relu(y + b1)
    z = jax.lax.conv_general_dilated(
        y, w2, (2, 2), [(1, 1), (1, 1)],
        dimension_numbers=("NHWC", "HWIO", "NHWC"),
        precision=jax.lax.Precision.HIGHEST)
    z = jax.nn.relu(z + b2)
    return jnp.transpose(z, (0, 3, 1, 2))


if __name__ == "__main__":
    # Deterministic inputs & synthetic weights, all derived from PRNGKey(0).
    kx, k1, k2, k3, k4 = jax.random.split(jax.random.PRNGKey(0), 5)
    w1 = jax.random.normal(k1, (3, 3, C_IN, C_MID), jnp.float32) * (2.0 / (9 * C_IN)) ** 0.5
    b1 = jax.random.normal(k2, (C_MID,), jnp.float32) * 0.01
    w2 = jax.random.normal(k3, (3, 3, C_MID, C_OUT), jnp.float32) * (2.0 / (9 * C_MID)) ** 0.5
    b2 = jax.random.normal(k4, (C_OUT,), jnp.float32) * 0.01
    params = (w1, b1, w2, b2)

    x = jax.random.normal(kx, (N, C_IN, H, W), jnp.float32)

    kparams = prepare_params(params)                       # one-time prep
    out = jax.block_until_ready(jax.jit(encoder_forward)(x, kparams))
    assert out.shape == (N, C_OUT, H2, W2), out.shape

    ref = jax.block_until_ready(encoder_reference(x, params))
    max_err = float(jnp.max(jnp.abs(out - ref)))
    # In-kernel matmuls run on the Mosaic f32 path; 2e-3 leaves margin for
    # accumulation-order differences vs the Precision.HIGHEST lax reference.
    assert jnp.allclose(out, ref, atol=2e-3, rtol=2e-3), max_err

    print("KERNEL_OK")
</pallas_src>

<mosaic_0001>
module attributes {stable_mosaic.version = 11 : i64} {
  func.func @fused_encoder_kernel(%arg0: memref<32x48xf32, #tpu.memory_space<vmem>>, %arg1: memref<2x32x32xf32, #tpu.memory_space<vmem>>, %arg2: memref<3x48x256xf32, #tpu.memory_space<vmem>>, %arg3: memref<1x256xf32, #tpu.memory_space<vmem>>, %arg4: memref<3x16x32xf32, #tpu.memory_space<vmem>>, %arg5: memref<768x256xf32, #tpu.memory_space<vmem>>, %arg6: memref<1x256xf32, #tpu.memory_space<vmem>>, %arg7: memref<16x256xf32, #tpu.memory_space<vmem>>) attributes {dimension_semantics = [], scalar_prefetch = 0 : i64, scratch_operands = 0 : i64, tpu.core_type = #tpu.core_type<tc>} {
    %c0 = arith.constant 0 : index
    %c0_0 = arith.constant 0 : index
    %0 = vector.load %arg0[%c0, %c0_0] : memref<32x48xf32, #tpu.memory_space<vmem>>, vector<32x48xf32>
    %c0_1 = arith.constant 0 : index
    %c0_2 = arith.constant 0 : index
    %c0_3 = arith.constant 0 : index
    %1 = vector.load %arg1[%c0_1, %c0_2, %c0_3] : memref<2x32x32xf32, #tpu.memory_space<vmem>>, vector<1x32x32xf32>
    %2 = vector.shape_cast %1 : vector<1x32x32xf32> to vector<32x32xf32>
    %cst = arith.constant dense<0.000000e+00> : vector<32x48xf32>
    %3 = tpu.matmul %2, %0, %cst {dimension_numbers = #tpu.dot_dimension_numbers<[1], [0], [0], [1], [0, 0, 1, 1], [], []>} : vector<32x32xf32>, vector<32x48xf32>, vector<32x48xf32> -> vector<32x48xf32>
    %c1 = arith.constant 1 : index
    %c0_4 = arith.constant 0 : index
    %c0_5 = arith.constant 0 : index
    %4 = vector.load %arg1[%c1, %c0_4, %c0_5] : memref<2x32x32xf32, #tpu.memory_space<vmem>>, vector<1x32x32xf32>
    %5 = vector.shape_cast %4 : vector<1x32x32xf32> to vector<32x32xf32>
    %cst_6 = arith.constant dense<0.000000e+00> : vector<32x48xf32>
    %6 = tpu.matmul %5, %0, %cst_6 {dimension_numbers = #tpu.dot_dimension_numbers<[1], [0], [0], [1], [0, 0, 1, 1], [], []>} : vector<32x32xf32>, vector<32x48xf32>, vector<32x48xf32> -> vector<32x48xf32>
    %c0_7 = arith.constant 0 : index
    %c0_8 = arith.constant 0 : index
    %c0_9 = arith.constant 0 : index
    %7 = vector.load %arg2[%c0_7, %c0_8, %c0_9] : memref<3x48x256xf32, #tpu.memory_space<vmem>>, vector<1x48x256xf32>
    %8 = vector.shape_cast %7 : vector<1x48x256xf32> to vector<48x256xf32>
    %cst_10 = arith.constant dense<0.000000e+00> : vector<32x256xf32>
    %9 = tpu.matmul %3, %8, %cst_10 {dimension_numbers = #tpu.dot_dimension_numbers<[1], [0], [0], [1], [0, 0, 1, 1], [], []>} : vector<32x48xf32>, vector<48x256xf32>, vector<32x256xf32> -> vector<32x256xf32>
    %c1_11 = arith.constant 1 : index
    %c0_12 = arith.constant 0 : index
    %c0_13 = arith.constant 0 : index
    %10 = vector.load %arg2[%c1_11, %c0_12, %c0_13] : memref<3x48x256xf32, #tpu.memory_space<vmem>>, vector<1x48x256xf32>
    %11 = vector.shape_cast %10 : vector<1x48x256xf32> to vector<48x256xf32>
    %cst_14 = arith.constant dense<0.000000e+00> : vector<32x256xf32>
    %12 = tpu.matmul %0, %11, %cst_14 {dimension_numbers = #tpu.dot_dimension_numbers<[1], [0], [0], [1], [0, 0, 1, 1], [], []>} : vector<32x48xf32>, vector<48x256xf32>, vector<32x256xf32> -> vector<32x256xf32>
    %13 = arith.addf %9, %12 : vector<32x256xf32>
    %c2 = arith.constant 2 : index
    %c0_15 = arith.constant 0 : index
    %c0_16 = arith.constant 0 : index
    %14 = vector.load %arg2[%c2, %c0_15, %c0_16] : memref<3x48x256xf32, #tpu.memory_space<vmem>>, vector<1x48x256xf32>
    %15 = vector.shape_cast %14 : vector<1x48x256xf32> to vector<48x256xf32>
    %cst_17 = arith.constant dense<0.000000e+00> : vector<32x256xf32>
    %16 = tpu.matmul %6, %15, %cst_17 {dimension_numbers = #tpu.dot_dimension_numbers<[1], [0], [0], [1], [0, 0, 1, 1], [], []>} : vector<32x48xf32>, vector<48x256xf32>, vector<32x256xf32> -> vector<32x256xf32>
    %17 = arith.addf %13, %16 : vector<32x256xf32>
    %c0_18 = arith.constant 0 : index
    %c0_19 = arith.constant 0 : index
    %18 = vector.load %arg3[%c0_18, %c0_19] : memref<1x256xf32, #tpu.memory_space<vmem>>, vector<1x256xf32>
    %19 = vector.broadcast %18 : vector<1x256xf32> to vector<32x256xf32>
    %20 = arith.addf %17, %19 : vector<32x256xf32>
    %cst_20 = arith.constant 0.000000e+00 : f32
    %21 = vector.broadcast %cst_20 : f32 to vector<32x256xf32>
    %22 = arith.maximumf %20, %21 : vector<32x256xf32>
    %c0_21 = arith.constant 0 : index
    %c0_22 = arith.constant 0 : index
    %c0_23 = arith.constant 0 : index
    %23 = vector.load %arg4[%c0_21, %c0_22, %c0_23] : memref<3x16x32xf32, #tpu.memory_space<vmem>>, vector<1x16x32xf32>
    %24 = vector.shape_cast %23 : vector<1x16x32xf32> to vector<16x32xf32>
    %cst_24 = arith.constant dense<0.000000e+00> : vector<16x256xf32>
    %25 = tpu.matmul %24, %22, %cst_24 {dimension_numbers = #tpu.dot_dimension_numbers<[1], [0], [0], [1], [0, 0, 1, 1], [], []>} : vector<16x32xf32>, vector<32x256xf32>, vector<16x256xf32> -> vector<16x256xf32>
    %c1_25 = arith.constant 1 : index
    %c0_26 = arith.constant 0 : index
    %c0_27 = arith.constant 0 : index
    %26 = vector.load %arg4[%c1_25, %c0_26, %c0_27] : memref<3x16x32xf32, #tpu.memory_space<vmem>>, vector<1x16x32xf32>
    %27 = vector.shape_cast %26 : vector<1x16x32xf32> to vector<16x32xf32>
    %cst_28 = arith.constant dense<0.000000e+00> : vector<16x256xf32>
    %28 = tpu.matmul %27, %22, %cst_28 {dimension_numbers = #tpu.dot_dimension_numbers<[1], [0], [0], [1], [0, 0, 1, 1], [], []>} : vector<16x32xf32>, vector<32x256xf32>, vector<16x256xf32> -> vector<16x256xf32>
    %c2_29 = arith.constant 2 : index
    %c0_30 = arith.constant 0 : index
    %c0_31 = arith.constant 0 : index
    %29 = vector.load %arg4[%c2_29, %c0_30, %c0_31] : memref<3x16x32xf32, #tpu.memory_space<vmem>>, vector<1x16x32xf32>
    %30 = vector.shape_cast %29 : vector<1x16x32xf32> to vector<16x32xf32>
    %cst_32 = arith.constant dense<0.000000e+00> : vector<16x256xf32>
    %31 = tpu.matmul %30, %22, %cst_32 {dimension_numbers = #tpu.dot_dimension_numbers<[1], [0], [0], [1], [0, 0, 1, 1], [], []>} : vector<16x32xf32>, vector<32x256xf32>, vector<16x256xf32> -> vector<16x256xf32>
    %32 = tpu.concatenate %25, %28, %31 in 1 : vector<16x256xf32>, vector<16x256xf32>, vector<16x256xf32> -> vector<16x768xf32>
    %c0_33 = arith.constant 0 : index
    %c0_34 = arith.constant 0 : index
    %33 = vector.load %arg5[%c0_33, %c0_34] : memref<768x256xf32, #tpu.memory_space<vmem>>, vector<768x256xf32>
    %cst_35 = arith.constant dense<0.000000e+00> : vector<16x256xf32>
    %34 = tpu.matmul %32, %33, %cst_35 {dimension_numbers = #tpu.dot_dimension_numbers<[1], [0], [0], [1], [0, 0, 1, 1], [], []>} : vector<16x768xf32>, vector<768x256xf32>, vector<16x256xf32> -> vector<16x256xf32>
    %c0_36 = arith.constant 0 : index
    %c0_37 = arith.constant 0 : index
    %35 = vector.load %arg6[%c0_36, %c0_37] : memref<1x256xf32, #tpu.memory_space<vmem>>, vector<1x256xf32>
    %36 = vector.broadcast %35 : vector<1x256xf32> to vector<16x256xf32>
    %37 = arith.addf %34, %36 : vector<16x256xf32>
    %cst_38 = arith.constant 0.000000e+00 : f32
    %38 = vector.broadcast %cst_38 : f32 to vector<16x256xf32>
    %39 = arith.maximumf %37, %38 : vector<16x256xf32>
    %c0_39 = arith.constant 0 : index
    %c0_40 = arith.constant 0 : index
    %40 = vector.load %arg7[%c0_39, %c0_40] : memref<16x256xf32, #tpu.memory_space<vmem>>, vector<16x256xf32>
    tpu.vector_store %arg7[%c0_39, %c0_40], %39 {strides = array<i32>} : memref<16x256xf32, #tpu.memory_space<vmem>>, vector<16x256xf32>,
    return
  }
}

</mosaic_0001>

<bundles_post_ra>
// kernel: encoder_forward.1
= control target key start
LH: loop header
LB: loop body
LE: loop exit
PB: predicated region body
PF: predicated region fallthrough
CT: control target
= control target key end

     0   :  { %12 = vsyncpa [#allocation3], 0  ;;  %s1181_s27 = smov [#allocation2]   ;;  %s1182_s29 = smov 256   ;;  %s1517_s0 = inlined_call_operand.vmem [shape: f32[32,48], index: 0, kind: input, shape index: {}]   ;;  %s1518_s1 = inlined_call_operand.vmem [shape: f32[2,32,32], index: 1, kind: input, shape index: {}]   ;;  %s1519_s2 = inlined_call_operand.vmem [shape: f32[3,48,256], index: 2, kind: input, shape index: {}]   ;;  %s1520_s3 = inlined_call_operand.vmem [shape: f32[1,256], index: 3, kind: input, shape index: {}]   ;;  %s1521_s4 = inlined_call_operand.vmem [shape: f32[3,16,32], index: 4, kind: input, shape index: {}]   ;;  %s1522_s5 = inlined_call_operand.hbm [shape: f32[768,256], index: 5, kind: input, shape index: {}]   ;;  %s1523_s6 = inlined_call_operand.vmem [shape: f32[1,256], index: 6, kind: input, shape index: {}]   ;;  %s1524_s7 = inlined_call_operand.vmem [shape: f32[16,256], index: 7, kind: output, shape index: {}]  }
   0x1   :  { %s27_s26 = sshll.u32 %s1522_s5, 4  ;;  %s29_s28 = sshll.u32 %s1181_s27, 4  ;;  %s28_s26 = int_to_ptr.hbm [resolvable:$true] %s27_s26  ;;  %s30_s28 = int_to_ptr.vmem [resolvable:$true] %s29_s28 }
   0x2   :  { %s1183_s30 = smov 16  }
   0x3   :  { %35 = dma.hbm_to_vmem [thread:$0]  %s28_s26, 24576, %s30_s28, [#allocation3], %s1182_s29, %s1182_s29, %s1183_s30  }
   0x4   :  { %1179 = dma.done.wait [#allocation3], 24576  }
   0x5   :  { %1180 = vsyncadd [#allocation3], 4294942720  ;;  %v1230_v0 = vld [vmem:[%s1517_s0 + $0x18] sm:$0xff]  ;;  %v1235_v1 = vld [vmem:[%s1517_s0 + $0x10] sm:$0xff]  ;;  %vm50_vm0 = vcmask 261120   ;;  %vm163_vm1 = vcmask 392192  }
   0x6   :  { %75 = vmatpush.msra.mxu0 %v1230_v0  ;;  %121 = vmatpush.msra.mxu1 %v1230_v0  ;;  %v1242_v2 = vld [vmem:[%s1517_s0 + $0x8] sm:$0xff]  ;;  %v42_v3 = vld [vmem:[%s1517_s0] sm:$0xff]  ;;  %v1090_v4 = vld [vmem:[%s1519_s2 + $0xb0] sm:$0xff] }
   0x7   :  { %v1091_v5 = vld [vmem:[%s1519_s2 + $0xb8] sm:$0xff]  ;;  %v46_v6 = vld [vmem:[%s1518_s1] sm:$0xff]  ;;  %186 = vmatpush.msra.mxu2 %v1090_v4  ;;  %v1089_v9 = vld [vmem:[%s1519_s2 + $0xa8] sm:$0xff] }
   0x8   :  { %76 = vmatpush.msra.mxu0 %v1235_v1  ;;  %122 = vmatpush.msra.mxu1 %v1235_v1  ;;  %v1072_v7 = vld [vmem:[%s1518_s1 + $0x20] sm:$0xff]  ;;  %v1086_v10 = vld [vmem:[%s1519_s2 + $0x90] sm:$0xff]  ;;  %v1087_v11 = vld [vmem:[%s1519_s2 + $0x98] sm:$0xff] }
   0x9   :  { %215 = vmatpush.msra.mxu3 %v1091_v5  ;;  %v1088_v8 = vld [vmem:[%s1519_s2 + $0xa0] sm:$0xff]  ;;  %v148_v12 = vld [vmem:[%s1519_s2 + $0x50] sm:$0xff]  ;;  %v149_v13 = vld [vmem:[%s1519_s2 + $0x58] sm:$0xff] }
   0xa   :  { %77 = vmatpush.msra.mxu0 %v1242_v2  ;;  %123 = vmatpush.msra.mxu1 %v1242_v2  ;;  %v146_v14 = vld [vmem:[%s1519_s2 + $0x40] sm:$0xff]  ;;  %v147_v15 = vld [vmem:[%s1519_s2 + $0x48] sm:$0xff]  ;;  %v144_v18 = vld [vmem:[%s1519_s2 + $0x30] sm:$0xff] }
   0xb   :  { %187 = vmatpush.msra.mxu2 %v1088_v8  ;;  %216 = vmatpush.msra.mxu3 %v1089_v9  ;;  %v1084_v16 = vld [vmem:[%s1519_s2 + $0x80] sm:$0xff]  ;;  %v1085_v17 = vld [vmem:[%s1519_s2 + $0x88] sm:$0xff]  ;;  %v145_v19 = vld [vmem:[%s1519_s2 + $0x38] sm:$0xff] }
   0xc   :  { %78 = vmatpush.msra.mxu0 %v42_v3  ;;  %124 = vmatpush.msra.mxu1 %v42_v3  ;;  %v1082_v20 = vld [vmem:[%s1519_s2 + $0x70] sm:$0xff]  ;;  %v1083_v21 = vld [vmem:[%s1519_s2 + $0x78] sm:$0xff]  ;;  %v47_v22 = vld [vmem:[%s1518_s1 + $0x8] sm:$0xff] }
   0xd   :  { %1068 = vmatmul.msk.f32.vlgmr.msra.gmra.mxu0 %vm50_vm0, %v46_v6  ;;  %1076 = vmatmul.msk.f32.vlgmr.msra.gmra.mxu1 %vm50_vm0, %v1072_v7  ;;  %v1073_v23 = vld [vmem:[%s1518_s1 + $0x28] sm:$0xff]  ;;  %v1080_v24 = vld [vmem:[%s1519_s2 + $0x60] sm:$0xff]  ;;  %v1118_v26 = vld [vmem:[%s1519_s2 + $0x110] sm:$0xff] }
   0xe   :  { %256 = vmatpush.msrb.mxu0 %v148_v12  ;;  %285 = vmatpush.msrb.mxu1 %v149_v13  ;;  %v1081_v25 = vld [vmem:[%s1519_s2 + $0x68] sm:$0xff]  ;;  %v1119_v27 = vld [vmem:[%s1519_s2 + $0x118] sm:$0xff]  ;;  %v142_v28 = vld [vmem:[%s1519_s2 + $0x20] sm:$0xff] }
   0xf   :  { %188 = vmatpush.msra.mxu2 %v1086_v10  ;;  %217 = vmatpush.msra.mxu3 %v1087_v11  ;;  %v143_v29 = vld [vmem:[%s1519_s2 + $0x28] sm:$0xff]  ;;  %v1116_v30 = vld [vmem:[%s1519_s2 + $0x100] sm:$0xff]  ;;  %v140_v32 = vld [vmem:[%s1519_s2 + $0x10] sm:$0xff] }
  0x10   :  { %257 = vmatpush.msrb.mxu0 %v146_v14  ;;  %286 = vmatpush.msrb.mxu1 %v147_v15  ;;  %v1117_v31 = vld [vmem:[%s1519_s2 + $0x108] sm:$0xff]  ;;  %v141_v33 = vld [vmem:[%s1519_s2 + $0x18] sm:$0xff]  ;;  %v1114_v34 = vld [vmem:[%s1519_s2 + $0xf0] sm:$0xff] }
  0x11   :  { %189 = vmatpush.msra.mxu2 %v1084_v16  ;;  %218 = vmatpush.msra.mxu3 %v1085_v17  ;;  %v1115_v35 = vld [vmem:[%s1519_s2 + $0xf8] sm:$0xff]  ;;  %v48_v36 = vld [vmem:[%s1518_s1 + $0x10] sm:$0xff]  ;;  %v1112_v38 = vld [vmem:[%s1519_s2 + $0xe0] sm:$0xff] }
  0x12   :  { %258 = vmatpush.msrb.mxu0 %v144_v18  ;;  %287 = vmatpush.msrb.mxu1 %v145_v19  ;;  %v1074_v37 = vld [vmem:[%s1518_s1 + $0x30] sm:$0xff]  ;;  %v1113_v39 = vld [vmem:[%s1519_s2 + $0xe8] sm:$0xff]  ;;  %v1111_v41 = vld [vmem:[%s1519_s2 + $0xd8] sm:$0xff] }
  0x13   :  { %190 = vmatpush.msra.mxu2 %v1082_v20  ;;  %219 = vmatpush.msra.mxu3 %v1083_v21  ;;  %v1110_v40 = vld [vmem:[%s1519_s2 + $0xd0] sm:$0xff]  ;;  %v49_v42 = vld [vmem:[%s1518_s1 + $0x18] sm:$0xff]  ;;  %v138_v44 = vld [vmem:[%s1519_s2] sm:$0xff] }
  0x14   :  { %259 = vmatpush.msrb.mxu0 %v142_v28  ;;  %288 = vmatpush.msrb.mxu1 %v143_v29  ;;  %v1075_v43 = vld [vmem:[%s1518_s1 + $0x38] sm:$0xff]  ;;  %v139_v45 = vld [vmem:[%s1519_s2 + $0x8] sm:$0xff]  ;;  %v1108_v46 = vld [vmem:[%s1519_s2 + $0xc0] sm:$0xff] }
  0x15   :  { %1069 = vmatmul.msk.f32.gmra.mxu0 %vm50_vm0, %v47_v22  ;;  %1077 = vmatmul.msk.f32.gmra.mxu1 %vm50_vm0, %v1073_v23  ;;  %v1109_v47 = vld [vmem:[%s1519_s2 + $0xc8] sm:$0xff]  ;;  %v395_v14 = vld [vmem:[%s1520_s3] sm:$0x3] }
  0x16   :  { %191 = vmatpush.msra.mxu2 %v1080_v24  ;;  %220 = vmatpush.msra.mxu3 %v1081_v25  ;;  %v397_v21 = vperm.slane %v395_v14, 0  ;;  %v398_v22 = vperm.slane %v395_v14, 1  ;;  %v667_v14 = vld [vmem:[#allocation2 + $0x2b0] sm:$0xff] }
  0x17   :  { %1092 = vmatmul.msk.f32.vlgmr.msra.gmra.mxu2 %vm163_vm1, %v42_v3  ;;  %1096 = vmatmul.msk.f32.vlgmr.msra.gmra.mxu3 %vm163_vm1, %v42_v3 }
  0x18   :  { %339 = vmatpush.msrb.mxu2 %v1118_v26  ;;  %368 = vmatpush.msrb.mxu3 %v1119_v27 }
  0x19   :  { %260 = vmatpush.msrb.mxu0 %v140_v32  ;;  %289 = vmatpush.msrb.mxu1 %v141_v33 }
  0x1a   :  { %340 = vmatpush.msrb.mxu2 %v1116_v30  ;;  %369 = vmatpush.msrb.mxu3 %v1117_v31 }
  0x1b   :  { %261 = vmatpush.msrb.mxu0 %v138_v44  ;;  %290 = vmatpush.msrb.mxu1 %v139_v45 }
  0x1c   :  { %341 = vmatpush.msrb.mxu2 %v1114_v34  ;;  %370 = vmatpush.msrb.mxu3 %v1115_v35 }
  0x1d   :  { %1070 = vmatmul.msk.f32.gmra.mxu0 %vm50_vm0, %v48_v36  ;;  %1078 = vmatmul.msk.f32.gmra.mxu1 %vm50_vm0, %v1074_v37 }
  0x1e   :  { %342 = vmatpush.msrb.mxu2 %v1112_v38  ;;  %371 = vmatpush.msrb.mxu3 %v1113_v39 }
  0x1f   :  { %1093 = vmatmul.msk.f32.gmra.mxu2 %vm163_vm1, %v1242_v2  ;;  %1097 = vmatmul.msk.f32.gmra.mxu3 %vm163_vm1, %v1242_v2 }
  0x20   :  { %343 = vmatpush.msrb.mxu2 %v1110_v40  ;;  %372 = vmatpush.msrb.mxu3 %v1111_v41 }
  0x22   :  { %344 = vmatpush.msrb.mxu2 %v1108_v46  ;;  %373 = vmatpush.msrb.mxu3 %v1109_v47 }
  0x25   :  { %1071 = vmatmul.msk.f32.gmra.mxu0 %vm50_vm0, %v49_v42  ;;  %1079 = vmatmul.msk.f32.gmra.mxu1 %vm50_vm0, %v1075_v43 }
  0x27   :  { %1094 = vmatmul.msk.f32.gmra.mxu2 %vm163_vm1, %v1235_v1  ;;  %1098 = vmatmul.msk.f32.gmra.mxu3 %vm163_vm1, %v1235_v1 }
  0x2f   :  { %1095 = vmatmul.msk.f32.gmra.mxu2 %vm163_vm1, %v1230_v0  ;;  %1099 = vmatmul.msk.f32.gmra.mxu3 %vm163_vm1, %v1230_v0 }
  0x8a   :  { %v80_v48 = vpop.f32.mrf.mxu0  ;;  %v126_v49 = vpop.f32.mrf.mxu1 }
  0x8b   :  { %1100 = vmatmul.msk.f32.vlgmr.msrb.gmra.mxu0 %vm163_vm1, %v80_v48  ;;  %1104 = vmatmul.msk.f32.vlgmr.msrb.gmra.mxu1 %vm163_vm1, %v80_v48 }
  0x8c   :  { %1120 = vmatmul.msk.f32.vlgmr.msrb.gmra.mxu2 %vm163_vm1, %v126_v49  ;;  %1124 = vmatmul.msk.f32.vlgmr.msrb.gmra.mxu3 %vm163_vm1, %v126_v49 }
  0x92   :  { %v83_v50 = vpop.f32.mrf.mxu0  ;;  %v129_v51 = vpop.f32.mrf.mxu1 }
  0x93   :  { %1101 = vmatmul.msk.f32.gmra.mxu0 %vm163_vm1, %v83_v50  ;;  %1105 = vmatmul.msk.f32.gmra.mxu1 %vm163_vm1, %v83_v50 }
  0x94   :  { %1121 = vmatmul.msk.f32.gmra.mxu2 %vm163_vm1, %v129_v51  ;;  %1125 = vmatmul.msk.f32.gmra.mxu3 %vm163_vm1, %v129_v51  ;;  %v417_v51 = vld [vmem:[%s1521_s4] sm:$0xff] }
  0x9a   :  { %v86_v52 = vpop.f32.mrf.mxu0  ;;  %v132_v53 = vpop.f32.mrf.mxu1 }
  0x9b   :  { %1102 = vmatmul.msk.f32.gmra.mxu0 %vm163_vm1, %v86_v52  ;;  %1106 = vmatmul.msk.f32.gmra.mxu1 %vm163_vm1, %v86_v52  ;;  %v193_v56 = vpop.f32.mrf.mxu2  ;;  %v222_v57 = vpop.f32.mrf.mxu3  ;;  %v418_v52 = vld [vmem:[%s1521_s4 + $0x8] sm:$0xff] }
  0x9c   :  { %1122 = vmatmul.msk.f32.gmra.mxu2 %vm163_vm1, %v132_v53  ;;  %1126 = vmatmul.msk.f32.gmra.mxu3 %vm163_vm1, %v132_v53  ;;  %v1132_v53 = vld [vmem:[%s1521_s4 + $0x10] sm:$0xff] }
  0xa2   :  { %v89_v54 = vpop.f32.mrf.mxu0  ;;  %v135_v55 = vpop.f32.mrf.mxu1 }
  0xa3   :  { %1103 = vmatmul.msk.f32.gmra.mxu0 %vm163_vm1, %v89_v54  ;;  %1107 = vmatmul.msk.f32.gmra.mxu1 %vm163_vm1, %v89_v54  ;;  %v196_v58 = vpop.f32.mrf.mxu2  ;;  %v225_v59 = vpop.f32.mrf.mxu3  ;;  %v1138_v54 = vld [vmem:[%s1521_s4 + $0x20] sm:$0xff] }
  0xa4   :  { %1123 = vmatmul.msk.f32.gmra.mxu2 %vm163_vm1, %v135_v55  ;;  %1127 = vmatmul.msk.f32.gmra.mxu3 %vm163_vm1, %v135_v55  ;;  %v611_v55 = vld [vmem:[#allocation2 + $0xf0] sm:$0xff] }
  0xab   :  { %v199_v60 = vpop.f32.mrf.mxu2  ;;  %v228_v61 = vpop.f32.mrf.mxu3 }
  0xb3   :  { %v202_v62 = vpop.f32.mrf.mxu2  ;;  %v231_v63 = vpop.f32.mrf.mxu3 }
 0x108   :  { %v263_v0 = vpop.f32.mrf.mxu0  ;;  %v292_v1 = vpop.f32.mrf.mxu1 }
 0x109   :  { %v264_v27 = vadd.f32 %v263_v0, %v193_v56  ;;  %v293_v31 = vadd.f32 %v292_v1, %v222_v57  ;;  %v643_v56 = vld [vmem:[#allocation2 + $0x1f0] sm:$0xff]  ;;  %v609_v57 = vld [vmem:[#allocation2 + $0xe0] sm:$0xff] }
 0x10a   :  { %v705_v0 = vld [vmem:[#allocation2 + $0x3e0] sm:$0xff] }
 0x10b   :  { %v605_v1 = vld [vmem:[#allocation2 + $0xc0] sm:$0xff] }
 0x10f   :  { %v346_v2 = vpop.f32.mrf.mxu2  ;;  %v375_v3 = vpop.f32.mrf.mxu3 }
 0x110   :  { %v266_v4 = vpop.f32.mrf.mxu0  ;;  %v295_v5 = vpop.f32.mrf.mxu1  ;;  %v387_v33 = vadd.f32 %v346_v2, %v264_v27  ;;  %v388_v37 = vadd.f32 %v375_v3, %v293_v31  ;;  %v671_v2 = vld [vmem:[#allocation2 + $0x2d0] sm:$0xff]  ;;  %v1133_v3 = vld [vmem:[%s1521_s4 + $0x18] sm:$0xff]  ;;  %v589_v31 = vld [vmem:[#allocation2 + $0x40] sm:$0xff] }
 0x111   :  { %v267_v17 = vadd.f32 %v266_v4, %v196_v58  ;;  %v296_v23 = vadd.f32 %v295_v5, %v225_v59  ;;  %v675_v58 = vld [vmem:[#allocation2 + $0x2f0] sm:$0xff]  ;;  %v641_v59 = vld [vmem:[#allocation2 + $0x1e0] sm:$0xff]  ;;  %v1139_v4 = vld [vmem:[%s1521_s4 + $0x28] sm:$0xff] }
 0x112   :  { %v401_v43 = vadd.f32 %v397_v21, %v387_v33  ;;  %v402_v45 = vadd.f32 %v398_v22, %v388_v37  ;;  %v603_v5 = vld [vmem:[#allocation2 + $0xb0] sm:$0xff]  ;;  %v621_v37 = vld [vmem:[#allocation2 + $0x140] sm:$0xff] }
 0x113   :  { %v591_v27 = vld [vmem:[#allocation2 + $0x50] sm:$0xff] }
 0x114   :  { %v409_v49 = vmax.f32 %v401_v43, 0.0  ;;  %v410_v50 = vmax.f32 %v402_v45, 0.0  ;;  %v623_v33 = vld [vmem:[#allocation2 + $0x150] sm:$0xff]  ;;  %v617_v45 = vld [vmem:[#allocation2 + $0x120] sm:$0xff] }
 0x115   :  { %v583_v43 = vld [vmem:[#allocation2 + $0x10] sm:$0xff] }
 0x117   :  { %v349_v6 = vpop.f32.mrf.mxu2  ;;  %v378_v7 = vpop.f32.mrf.mxu3 }
 0x118   :  { %v269_v8 = vpop.f32.mrf.mxu0  ;;  %v298_v9 = vpop.f32.mrf.mxu1  ;;  %v389_v28 = vadd.f32 %v349_v6, %v267_v17  ;;  %v390_v32 = vadd.f32 %v378_v7, %v296_v23  ;;  %v637_v6 = vld [vmem:[#allocation2 + $0x1c0] sm:$0xff]  ;;  %v631_v17 = vld [vmem:[#allocation2 + $0x190] sm:$0xff] }
 0x119   :  { %v270_v15 = vadd.f32 %v269_v8, %v199_v60  ;;  %v299_v16 = vadd.f32 %v298_v9, %v228_v61  ;;  %v707_v60 = vld [vmem:[#allocation2 + $0x3f0] sm:$0xff]  ;;  %v601_v7 = vld [vmem:[#allocation2 + $0xa0] sm:$0xff] }
 0x11a   :  { %v403_v39 = vadd.f32 %v397_v21, %v389_v28  ;;  %v404_v42 = vadd.f32 %v398_v22, %v390_v32  ;;  %v607_v61 = vld [vmem:[#allocation2 + $0xd0] sm:$0xff]  ;;  %v593_v23 = vld [vmem:[#allocation2 + $0x60] sm:$0xff] }
 0x11b   :  { %v703_v8 = vld [vmem:[#allocation2 + $0x3d0] sm:$0xff]  ;;  %v693_v28 = vld [vmem:[#allocation2 + $0x380] sm:$0xff] }
 0x11c   :  { %v411_v47 = vmax.f32 %v403_v39, 0.0  ;;  %v412_v48 = vmax.f32 %v404_v42, 0.0  ;;  %v635_v9 = vld [vmem:[#allocation2 + $0x1b0] sm:$0xff]  ;;  %v585_v39 = vld [vmem:[#allocation2 + $0x20] sm:$0xff] }
 0x11d   :  { %v691_v32 = vld [vmem:[#allocation2 + $0x370] sm:$0xff]  ;;  %v653_v42 = vld [vmem:[#allocation2 + $0x240] sm:$0xff] }
 0x11f   :  { %v352_v10 = vpop.f32.mrf.mxu2  ;;  %v381_v11 = vpop.f32.mrf.mxu3 }
 0x120   :  { %v272_v12 = vpop.f32.mrf.mxu0  ;;  %v301_v13 = vpop.f32.mrf.mxu1  ;;  %v391_v18 = vadd.f32 %v352_v10, %v270_v15  ;;  %v392_v24 = vadd.f32 %v381_v11, %v299_v16  ;;  %v669_v10 = vld [vmem:[#allocation2 + $0x2c0] sm:$0xff]  ;;  %v599_v11 = vld [vmem:[#allocation2 + $0x90] sm:$0xff] }
 0x121   :  { %v273_v19 = vadd.f32 %v272_v12, %v202_v62  ;;  %v302_v20 = vadd.f32 %v301_v13, %v231_v63  ;;  %v673_v62 = vld [vmem:[#allocation2 + $0x2e0] sm:$0xff]  ;;  %v639_v63 = vld [vmem:[#allocation2 + $0x1d0] sm:$0xff] }
 0x122   :  { %v405_v34 = vadd.f32 %v397_v21, %v391_v18  ;;  %v406_v38 = vadd.f32 %v398_v22, %v392_v24  ;;  %v701_v12 = vld [vmem:[#allocation2 + $0x3c0] sm:$0xff]  ;;  %v699_v16 = vld [vmem:[#allocation2 + $0x3b0] sm:$0xff] }
 0x123   :  { %v633_v13 = vld [vmem:[#allocation2 + $0x1a0] sm:$0xff]  ;;  %v695_v24 = vld [vmem:[#allocation2 + $0x390] sm:$0xff] }
 0x124   :  { %v413_v44 = vmax.f32 %v405_v34, 0.0  ;;  %v414_v46 = vmax.f32 %v406_v38, 0.0  ;;  %v597_v15 = vld [vmem:[#allocation2 + $0x80] sm:$0xff]  ;;  %v655_v38 = vld [vmem:[#allocation2 + $0x250] sm:$0xff] }
 0x125   :  { %v665_v18 = vld [vmem:[#allocation2 + $0x2a0] sm:$0xff] }
 0x126   :  { %v657_v34 = vld [vmem:[#allocation2 + $0x260] sm:$0xff] }
 0x127   :  { %v355_v25 = vpop.f32.mrf.mxu2  ;;  %v384_v26 = vpop.f32.mrf.mxu3 }
 0x128   :  { %v393_v29 = vadd.f32 %v355_v25, %v273_v19  ;;  %v394_v30 = vadd.f32 %v384_v26, %v302_v20  ;;  %v595_v19 = vld [vmem:[#allocation2 + $0x70] sm:$0xff]  ;;  %v697_v20 = vld [vmem:[#allocation2 + $0x3a0] sm:$0xff] }
 0x129   :  { %v627_v25 = vld [vmem:[#allocation2 + $0x170] sm:$0xff]  ;;  %v661_v26 = vld [vmem:[#allocation2 + $0x280] sm:$0xff] }
 0x12a   :  { %v407_v35 = vadd.f32 %v397_v21, %v393_v29  ;;  %v408_v36 = vadd.f32 %v398_v22, %v394_v30  ;;  %v629_v21 = vld [vmem:[#allocation2 + $0x180] sm:$0xff]  ;;  %v663_v22 = vld [vmem:[#allocation2 + $0x290] sm:$0xff] }
 0x12b   :  { %v625_v29 = vld [vmem:[#allocation2 + $0x160] sm:$0xff]  ;;  %v659_v30 = vld [vmem:[#allocation2 + $0x270] sm:$0xff] }
 0x12c   :  { %v415_v40 = vmax.f32 %v407_v35, 0.0  ;;  %v416_v41 = vmax.f32 %v408_v36, 0.0  ;;  %v587_v35 = vld [vmem:[#allocation2 + $0x30] sm:$0xff]  ;;  %v689_v36 = vld [vmem:[#allocation2 + $0x360] sm:$0xff] }
 0x12e   :  { %437 = vmatpush.msra.mxu0 %v415_v40  ;;  %1144 = vmatpush.msra.mxu2 %v415_v40 }
 0x12f   :  { %460 = vmatpush.msra.mxu1 %v416_v41  ;;  %1148 = vmatpush.msra.mxu3 %v416_v41 }
 0x130   :  { %438 = vmatpush.msra.mxu0 %v413_v44  ;;  %1145 = vmatpush.msra.mxu2 %v413_v44 }
 0x131   :  { %461 = vmatpush.msra.mxu1 %v414_v46  ;;  %1149 = vmatpush.msra.mxu3 %v414_v46 }
 0x132   :  { %439 = vmatpush.msra.mxu0 %v411_v47  ;;  %1146 = vmatpush.msra.mxu2 %v411_v47 }
 0x133   :  { %462 = vmatpush.msra.mxu1 %v412_v48  ;;  %1150 = vmatpush.msra.mxu3 %v412_v48 }
 0x134   :  { %440 = vmatpush.msra.mxu0 %v409_v49  ;;  %1147 = vmatpush.msra.mxu2 %v409_v49 }
 0x135   :  { %463 = vmatpush.msra.mxu1 %v410_v50  ;;  %1151 = vmatpush.msra.mxu3 %v410_v50 }
 0x136   :  { %1128 = vmatmul.msk.f32.vlgmr.msra.gmra.mxu0 %vm50_vm0, %v417_v51  ;;  %1129 = vmatmul.msk.f32.vlgmr.msra.gmra.mxu2 %vm50_vm0, %v418_v52 }
 0x137   :  { %1131 = vmatmul.msk.f32.vlgmr.msra.gmra.mxu3 %vm50_vm0, %v418_v52  ;;  %492 = vmatpush.msrb.mxu2 %v415_v40  ;;  %v681_v52 = vld [vmem:[#allocation2 + $0x320] sm:$0xff] }
 0x138   :  { %515 = vmatpush.msrb.mxu3 %v416_v41  ;;  %547 = vmatpush.msrb.mxu0 %v415_v40  ;;  %v687_v40 = vld [vmem:[#allocation2 + $0x350] sm:$0xff] }
 0x139   :  { %570 = vmatpush.msrb.mxu1 %v416_v41  ;;  %493 = vmatpush.msrb.mxu2 %v413_v44  ;;  %v619_v41 = vld [vmem:[#allocation2 + $0x130] sm:$0xff] }
 0x13a   :  { %1130 = vmatmul.msk.f32.vlgmr.msra.gmra.mxu1 %vm50_vm0, %v417_v51  ;;  %516 = vmatpush.msrb.mxu3 %v414_v46  ;;  %v649_v51 = vld [vmem:[#allocation2 + $0x220] sm:$0xff] }
 0x13b   :  { %548 = vmatpush.msrb.mxu0 %v413_v44  ;;  %571 = vmatpush.msrb.mxu1 %v414_v46  ;;  %v685_v44 = vld [vmem:[#allocation2 + $0x340] sm:$0xff]  ;;  %v651_v46 = vld [vmem:[#allocation2 + $0x230] sm:$0xff] }
 0x13c   :  { %494 = vmatpush.msrb.mxu2 %v411_v47  ;;  %517 = vmatpush.msrb.mxu3 %v412_v48 }
 0x13d   :  { %549 = vmatpush.msrb.mxu0 %v411_v47  ;;  %572 = vmatpush.msrb.mxu1 %v412_v48  ;;  %v581_v47 = vld [vmem:[#allocation2] sm:$0xff]  ;;  %v683_v48 = vld [vmem:[#allocation2 + $0x330] sm:$0xff] }
 0x13e   :  { %495 = vmatpush.msrb.mxu2 %v409_v49  ;;  %518 = vmatpush.msrb.mxu3 %v410_v50 }
 0x13f   :  { %550 = vmatpush.msrb.mxu0 %v409_v49  ;;  %573 = vmatpush.msrb.mxu1 %v410_v50  ;;  %v615_v49 = vld [vmem:[#allocation2 + $0x110] sm:$0xff] }
 0x140   :  { %1134 = vmatmul.msk.f32.vlgmr.msrb.gmra.mxu2 %vm50_vm0, %v1132_v53  ;;  %1136 = vmatmul.msk.f32.vlgmr.msrb.gmra.mxu3 %vm50_vm0, %v1132_v53  ;;  %v739_v50 = vld [vmem:[#allocation2 + $0x4f0] sm:$0xff]  ;;  %v613_v53 = vld [vmem:[#allocation2 + $0x100] sm:$0xff] }
 0x141   :  { %1140 = vmatmul.msk.f32.vlgmr.msrb.gmra.mxu0 %vm50_vm0, %v1138_v54  ;;  %779 = vmatpush.msra.mxu2 %v611_v55  ;;  %v771_v55 = vld [vmem:[#allocation2 + $0x5f0] sm:$0xff] }
 0x142   :  { %1142 = vmatmul.msk.f32.vlgmr.msrb.gmra.mxu1 %vm50_vm0, %v1138_v54  ;;  %802 = vmatpush.msra.mxu3 %v643_v56  ;;  %v737_v54 = vld [vmem:[#allocation2 + $0x4e0] sm:$0xff]  ;;  %v647_v56 = vld [vmem:[#allocation2 + $0x210] sm:$0xff] }
 0x143   :  { %780 = vmatpush.msra.mxu2 %v609_v57  ;;  %825 = vmatpush.msra.mxu0 %v675_v58  ;;  %v735_v57 = vld [vmem:[#allocation2 + $0x4d0] sm:$0xff] }
 0x144   :  { %803 = vmatpush.msra.mxu3 %v641_v59  ;;  %848 = vmatpush.msra.mxu1 %v707_v60  ;;  %v679_v58 = vld [vmem:[#allocation2 + $0x310] sm:$0xff]  ;;  %v769_v59 = vld [vmem:[#allocation2 + $0x5e0] sm:$0xff] }
 0x145   :  { %781 = vmatpush.msra.mxu2 %v607_v61  ;;  %826 = vmatpush.msra.mxu0 %v673_v62  ;;  %v645_v60 = vld [vmem:[#allocation2 + $0x200] sm:$0xff] }
 0x146   :  { %804 = vmatpush.msra.mxu3 %v639_v63  ;;  %849 = vmatpush.msra.mxu1 %v705_v0  ;;  %v733_v61 = vld [vmem:[#allocation2 + $0x4c0] sm:$0xff]  ;;  %v767_v63 = vld [vmem:[#allocation2 + $0x5d0] sm:$0xff]  ;;  %v612_v0 = vld [vmem:[#allocation2 + $0xf8] sm:$0xff] }
 0x147   :  { %782 = vmatpush.msra.mxu2 %v605_v1  ;;  %827 = vmatpush.msra.mxu0 %v671_v2  ;;  %v677_v62 = vld [vmem:[#allocation2 + $0x300] sm:$0xff]  ;;  %v731_v1 = vld [vmem:[#allocation2 + $0x4b0] sm:$0xff]  ;;  %v644_v2 = vld [vmem:[#allocation2 + $0x1f8] sm:$0xff] }
 0x148   :  { %1135 = vmatmul.msk.f32.gmra.mxu2 %vm50_vm0, %v1133_v3  ;;  %1137 = vmatmul.msk.f32.gmra.mxu3 %vm50_vm0, %v1133_v3  ;;  %v765_v3 = vld [vmem:[#allocation2 + $0x5c0] sm:$0xff] }
 0x149   :  { %1141 = vmatmul.msk.f32.gmra.mxu0 %vm50_vm0, %v1139_v4  ;;  %783 = vmatpush.msra.mxu2 %v603_v5  ;;  %v729_v5 = vld [vmem:[#allocation2 + $0x4a0] sm:$0xff] }
 0x14a   :  { %1143 = vmatmul.msk.f32.gmra.mxu1 %vm50_vm0, %v1139_v4  ;;  %805 = vmatpush.msra.mxu3 %v637_v6  ;;  %v610_v4 = vld [vmem:[#allocation2 + $0xe8] sm:$0xff] }
 0x14b   :  { %784 = vmatpush.msra.mxu2 %v601_v7  ;;  %850 = vmatpush.msra.mxu1 %v703_v8  ;;  %v642_v6 = vld [vmem:[#allocation2 + $0x1e8] sm:$0xff]  ;;  %v763_v7 = vld [vmem:[#allocation2 + $0x5b0] sm:$0xff]  ;;  %v608_v8 = vld [vmem:[#allocation2 + $0xd8] sm:$0xff] }
 0x14c   :  { %806 = vmatpush.msra.mxu3 %v635_v9  ;;  %828 = vmatpush.msra.mxu0 %v669_v10  ;;  %v727_v9 = vld [vmem:[#allocation2 + $0x490] sm:$0xff]  ;;  %v640_v10 = vld [vmem:[#allocation2 + $0x1d8] sm:$0xff] }
 0x14d   :  { %785 = vmatpush.msra.mxu2 %v599_v11  ;;  %851 = vmatpush.msra.mxu1 %v701_v12  ;;  %v761_v11 = vld [vmem:[#allocation2 + $0x5a0] sm:$0xff]  ;;  %v606_v12 = vld [vmem:[#allocation2 + $0xc8] sm:$0xff] }
 0x14e   :  { %807 = vmatpush.msra.mxu3 %v633_v13  ;;  %829 = vmatpush.msra.mxu0 %v667_v14  ;;  %v725_v13 = vld [vmem:[#allocation2 + $0x480] sm:$0xff]  ;;  %v638_v14 = vld [vmem:[#allocation2 + $0x1c8] sm:$0xff] }
 0x14f   :  { %786 = vmatpush.msra.mxu2 %v597_v15  ;;  %852 = vmatpush.msra.mxu1 %v699_v16  ;;  %v759_v15 = vld [vmem:[#allocation2 + $0x590] sm:$0xff]  ;;  %v604_v16 = vld [vmem:[#allocation2 + $0xb8] sm:$0xff] }
 0x150   :  { %808 = vmatpush.msra.mxu3 %v631_v17  ;;  %830 = vmatpush.msra.mxu0 %v665_v18  ;;  %v723_v17 = vld [vmem:[#allocation2 + $0x470] sm:$0xff]  ;;  %v636_v18 = vld [vmem:[#allocation2 + $0x1b8] sm:$0xff] }
 0x151   :  { %787 = vmatpush.msra.mxu2 %v595_v19  ;;  %853 = vmatpush.msra.mxu1 %v697_v20  ;;  %v757_v19 = vld [vmem:[#allocation2 + $0x580] sm:$0xff]  ;;  %v602_v20 = vld [vmem:[#allocation2 + $0xa8] sm:$0xff] }
 0x152   :  { %809 = vmatpush.msra.mxu3 %v629_v21  ;;  %831 = vmatpush.msra.mxu0 %v663_v22  ;;  %v721_v21 = vld [vmem:[#allocation2 + $0x460] sm:$0xff]  ;;  %v634_v22 = vld [vmem:[#allocation2 + $0x1a8] sm:$0xff] }
 0x153   :  { %788 = vmatpush.msra.mxu2 %v593_v23  ;;  %854 = vmatpush.msra.mxu1 %v695_v24  ;;  %v755_v23 = vld [vmem:[#allocation2 + $0x570] sm:$0xff]  ;;  %v600_v24 = vld [vmem:[#allocation2 + $0x98] sm:$0xff] }
 0x154   :  { %810 = vmatpush.msra.mxu3 %v627_v25  ;;  %832 = vmatpush.msra.mxu0 %v661_v26  ;;  %v719_v25 = vld [vmem:[#allocation2 + $0x450] sm:$0xff]  ;;  %v632_v26 = vld [vmem:[#allocation2 + $0x198] sm:$0xff] }
 0x155   :  { %789 = vmatpush.msra.mxu2 %v591_v27  ;;  %855 = vmatpush.msra.mxu1 %v693_v28  ;;  %v753_v27 = vld [vmem:[#allocation2 + $0x560] sm:$0xff]  ;;  %v598_v28 = vld [vmem:[#allocation2 + $0x88] sm:$0xff] }
 0x156   :  { %811 = vmatpush.msra.mxu3 %v625_v29  ;;  %833 = vmatpush.msra.mxu0 %v659_v30  ;;  %v717_v29 = vld [vmem:[#allocation2 + $0x440] sm:$0xff]  ;;  %v751_v30 = vld [vmem:[#allocation2 + $0x550] sm:$0xff] }
 0x157   :  { %790 = vmatpush.msra.mxu2 %v589_v31  ;;  %856 = vmatpush.msra.mxu1 %v691_v32  ;;  %v715_v31 = vld [vmem:[#allocation2 + $0x430] sm:$0xff]  ;;  %v749_v32 = vld [vmem:[#allocation2 + $0x540] sm:$0xff] }
 0x158   :  { %812 = vmatpush.msra.mxu3 %v623_v33  ;;  %834 = vmatpush.msra.mxu0 %v657_v34  ;;  %v713_v33 = vld [vmem:[#allocation2 + $0x420] sm:$0xff]  ;;  %v747_v34 = vld [vmem:[#allocation2 + $0x530] sm:$0xff] }
 0x159   :  { %791 = vmatpush.msra.mxu2 %v587_v35  ;;  %857 = vmatpush.msra.mxu1 %v689_v36  ;;  %v711_v35 = vld [vmem:[#allocation2 + $0x410] sm:$0xff]  ;;  %v745_v36 = vld [vmem:[#allocation2 + $0x520] sm:$0xff] }
 0x15a   :  { %813 = vmatpush.msra.mxu3 %v621_v37  ;;  %835 = vmatpush.msra.mxu0 %v655_v38  ;;  %v630_v37 = vld [vmem:[#allocation2 + $0x188] sm:$0xff]  ;;  %v709_v38 = vld [vmem:[#allocation2 + $0x400] sm:$0xff] }
 0x15b   :  { %792 = vmatpush.msra.mxu2 %v585_v39  ;;  %858 = vmatpush.msra.mxu1 %v687_v40  ;;  %v743_v39 = vld [vmem:[#allocation2 + $0x510] sm:$0xff]  ;;  %v596_v40 = vld [vmem:[#allocation2 + $0x78] sm:$0xff] }
 0x15c   :  { %814 = vmatpush.msra.mxu3 %v619_v41  ;;  %836 = vmatpush.msra.mxu0 %v653_v42  ;;  %v628_v41 = vld [vmem:[#allocation2 + $0x178] sm:$0xff]  ;;  %v741_v42 = vld [vmem:[#allocation2 + $0x500] sm:$0xff] }
 0x15d   :  { %793 = vmatpush.msra.mxu2 %v583_v43  ;;  %859 = vmatpush.msra.mxu1 %v685_v44  ;;  %v594_v43 = vld [vmem:[#allocation2 + $0x68] sm:$0xff] }
 0x15e   :  { %815 = vmatpush.msra.mxu3 %v617_v45  ;;  %837 = vmatpush.msra.mxu0 %v651_v46  ;;  %v626_v44 = vld [vmem:[#allocation2 + $0x168] sm:$0xff]  ;;  %v592_v45 = vld [vmem:[#allocation2 + $0x58] sm:$0xff] }
 0x15f   :  { %794 = vmatpush.msra.mxu2 %v581_v47  ;;  %860 = vmatpush.msra.mxu1 %v683_v48  ;;  %v624_v46 = vld [vmem:[#allocation2 + $0x158] sm:$0xff]  ;;  %v590_v47 = vld [vmem:[#allocation2 + $0x48] sm:$0xff] }
 0x160   :  { %816 = vmatpush.msra.mxu3 %v615_v49  ;;  %838 = vmatpush.msra.mxu0 %v649_v51  ;;  %v622_v48 = vld [vmem:[#allocation2 + $0x148] sm:$0xff]  ;;  %v588_v49 = vld [vmem:[#allocation2 + $0x38] sm:$0xff] }
 0x161   :  { %871 = vmatpush.msrb.mxu2 %v739_v50  ;;  %861 = vmatpush.msra.mxu1 %v681_v52  ;;  %v620_v50 = vld [vmem:[#allocation2 + $0x138] sm:$0xff]  ;;  %v586_v51 = vld [vmem:[#allocation2 + $0x28] sm:$0xff] }
 0x162   :  { %817 = vmatpush.msra.mxu3 %v613_v53  ;;  %839 = vmatpush.msra.mxu0 %v647_v56  ;;  %v618_v52 = vld [vmem:[#allocation2 + $0x128] sm:$0xff]  ;;  %v584_v53 = vld [vmem:[#allocation2 + $0x18] sm:$0xff] }
 0x163   :  { %872 = vmatpush.msrb.mxu2 %v737_v54  ;;  %862 = vmatpush.msra.mxu1 %v679_v58  ;;  %v616_v54 = vld [vmem:[#allocation2 + $0x118] sm:$0xff]  ;;  %v614_v56 = vld [vmem:[#allocation2 + $0x108] sm:$0xff] }
 0x164   :  { %894 = vmatpush.msrb.mxu3 %v771_v55  ;;  %840 = vmatpush.msra.mxu0 %v645_v60  ;;  %v582_v55 = vld [vmem:[#allocation2 + $0x8] sm:$0xff]  ;;  %v708_v60 = vld [vmem:[#allocation2 + $0x3f8] sm:$0xff] }
 0x165   :  { %873 = vmatpush.msrb.mxu2 %v735_v57  ;;  %863 = vmatpush.msra.mxu1 %v677_v62  ;;  %v676_v57 = vld [vmem:[#allocation2 + $0x2f8] sm:$0xff] }
 0x166   :  { %895 = vmatpush.msrb.mxu3 %v769_v59  ;;  %917 = vmatpush.msrb.mxu0 %v612_v0  ;;  %v674_v59 = vld [vmem:[#allocation2 + $0x2e8] sm:$0xff] }
 0x167   :  { %874 = vmatpush.msrb.mxu2 %v733_v61  ;;  %940 = vmatpush.msrb.mxu1 %v644_v2  ;;  %v672_v61 = vld [vmem:[#allocation2 + $0x2d8] sm:$0xff]  ;;  %v670_v0 = vld [vmem:[#allocation2 + $0x2c8] sm:$0xff] }
 0x168   :  { %896 = vmatpush.msrb.mxu3 %v767_v63  ;;  %918 = vmatpush.msrb.mxu0 %v610_v4  ;;  %v706_v63 = vld [vmem:[#allocation2 + $0x3e8] sm:$0xff]  ;;  %v668_v4 = vld [vmem:[#allocation2 + $0x2b8] sm:$0xff] }
 0x169   :  { %875 = vmatpush.msrb.mxu2 %v731_v1  ;;  %941 = vmatpush.msrb.mxu1 %v642_v6  ;;  %v666_v6 = vld [vmem:[#allocation2 + $0x2a8] sm:$0xff] }
 0x16a   :  { %897 = vmatpush.msrb.mxu3 %v765_v3  ;;  %919 = vmatpush.msrb.mxu0 %v608_v8  ;;  %v704_v3 = vld [vmem:[#allocation2 + $0x3d8] sm:$0xff] }
 0x16b   :  { %876 = vmatpush.msrb.mxu2 %v729_v5  ;;  %942 = vmatpush.msrb.mxu1 %v640_v10  ;;  %v702_v5 = vld [vmem:[#allocation2 + $0x3c8] sm:$0xff]  ;;  %v664_v8 = vld [vmem:[#allocation2 + $0x298] sm:$0xff] }
 0x16c   :  { %898 = vmatpush.msrb.mxu3 %v763_v7  ;;  %920 = vmatpush.msrb.mxu0 %v606_v12  ;;  %v700_v7 = vld [vmem:[#allocation2 + $0x3b8] sm:$0xff]  ;;  %v662_v10 = vld [vmem:[#allocation2 + $0x288] sm:$0xff] }
 0x16d   :  { %877 = vmatpush.msrb.mxu2 %v727_v9  ;;  %943 = vmatpush.msrb.mxu1 %v638_v14  ;;  %v698_v9 = vld [vmem:[#allocation2 + $0x3a8] sm:$0xff]  ;;  %v696_v12 = vld [vmem:[#allocation2 + $0x398] sm:$0xff] }
 0x16e   :  { %899 = vmatpush.msrb.mxu3 %v761_v11  ;;  %921 = vmatpush.msrb.mxu0 %v604_v16  ;;  %v772_v16 = vld [vmem:[#allocation2 + $0x5f8] sm:$0xff] }
 0x16f   :  { %878 = vmatpush.msrb.mxu2 %v725_v13  ;;  %944 = vmatpush.msrb.mxu1 %v636_v18  ;;  %v740_v13 = vld [vmem:[#allocation2 + $0x4f8] sm:$0xff]  ;;  %v694_v18 = vld [vmem:[#allocation2 + $0x388] sm:$0xff] }
 0x170   :  { %900 = vmatpush.msrb.mxu3 %v759_v15  ;;  %922 = vmatpush.msrb.mxu0 %v602_v20  ;;  %v738_v20 = vld [vmem:[#allocation2 + $0x4e8] sm:$0xff] }
 0x171   :  { %879 = vmatpush.msrb.mxu2 %v723_v17  ;;  %945 = vmatpush.msrb.mxu1 %v634_v22  ;;  %v660_v17 = vld [vmem:[#allocation2 + $0x278] sm:$0xff]  ;;  %v658_v22 = vld [vmem:[#allocation2 + $0x268] sm:$0xff] }
 0x172   :  { %901 = vmatpush.msrb.mxu3 %v757_v19  ;;  %923 = vmatpush.msrb.mxu0 %v600_v24  ;;  %v736_v24 = vld [vmem:[#allocation2 + $0x4d8] sm:$0xff] }
 0x173   :  { %880 = vmatpush.msrb.mxu2 %v721_v21  ;;  %946 = vmatpush.msrb.mxu1 %v632_v26  ;;  %v770_v21 = vld [vmem:[#allocation2 + $0x5e8] sm:$0xff]  ;;  %v656_v26 = vld [vmem:[#allocation2 + $0x258] sm:$0xff] }
 0x174   :  { %902 = vmatpush.msrb.mxu3 %v755_v23  ;;  %924 = vmatpush.msrb.mxu0 %v598_v28  ;;  %v692_v23 = vld [vmem:[#allocation2 + $0x378] sm:$0xff]  ;;  %v734_v28 = vld [vmem:[#allocation2 + $0x4c8] sm:$0xff] }
 0x175   :  { %881 = vmatpush.msrb.mxu2 %v719_v25  ;;  %947 = vmatpush.msrb.mxu1 %v630_v37  ;;  %v768_v25 = vld [vmem:[#allocation2 + $0x5d8] sm:$0xff] }
 0x176   :  { %903 = vmatpush.msrb.mxu3 %v753_v27  ;;  %925 = vmatpush.msrb.mxu0 %v596_v40  ;;  %v690_v27 = vld [vmem:[#allocation2 + $0x368] sm:$0xff]  ;;  %v652_v37 = vld [vmem:[#allocation2 + $0x238] sm:$0xff] }
 0x177   :  { %882 = vmatpush.msrb.mxu2 %v717_v29  ;;  %948 = vmatpush.msrb.mxu1 %v628_v41  ;;  %v730_v40 = vld [vmem:[#allocation2 + $0x4a8] sm:$0xff] }
 0x178   :  { %904 = vmatpush.msrb.mxu3 %v751_v30  ;;  %926 = vmatpush.msrb.mxu0 %v594_v43  ;;  %v762_v41 = vld [vmem:[#allocation2 + $0x5a8] sm:$0xff]  ;;  %v684_v43 = vld [vmem:[#allocation2 + $0x338] sm:$0xff] }
 0x179   :  { %883 = vmatpush.msrb.mxu2 %v715_v31  ;;  %949 = vmatpush.msrb.mxu1 %v626_v44  ;;  %v766_v31 = vld [vmem:[#allocation2 + $0x5c8] sm:$0xff]  ;;  %v728_v44 = vld [vmem:[#allocation2 + $0x498] sm:$0xff] }
 0x17a   :  { %905 = vmatpush.msrb.mxu3 %v749_v32  ;;  %927 = vmatpush.msrb.mxu0 %v592_v45  ;;  %v654_v32 = vld [vmem:[#allocation2 + $0x248] sm:$0xff]  ;;  %v760_v45 = vld [vmem:[#allocation2 + $0x598] sm:$0xff] }
 0x17b   :  { %884 = vmatpush.msrb.mxu2 %v713_v33  ;;  %950 = vmatpush.msrb.mxu1 %v624_v46  ;;  %v688_v33 = vld [vmem:[#allocation2 + $0x358] sm:$0xff] }
 0x17c   :  { %906 = vmatpush.msrb.mxu3 %v747_v34  ;;  %928 = vmatpush.msrb.mxu0 %v590_v47  ;;  %v732_v34 = vld [vmem:[#allocation2 + $0x4b8] sm:$0xff]  ;;  %v682_v47 = vld [vmem:[#allocation2 + $0x328] sm:$0xff] }
 0x17d   :  { %885 = vmatpush.msrb.mxu2 %v711_v35  ;;  %951 = vmatpush.msrb.mxu1 %v622_v48  ;;  %v648_v46 = vld [vmem:[#allocation2 + $0x218] sm:$0xff]  ;;  %v726_v48 = vld [vmem:[#allocation2 + $0x488] sm:$0xff] }
 0x17e   :  { %907 = vmatpush.msrb.mxu3 %v745_v36  ;;  %929 = vmatpush.msrb.mxu0 %v588_v49  ;;  %v764_v36 = vld [vmem:[#allocation2 + $0x5b8] sm:$0xff]  ;;  %v758_v49 = vld [vmem:[#allocation2 + $0x588] sm:$0xff] }
 0x17f   :  { %886 = vmatpush.msrb.mxu2 %v709_v38  ;;  %952 = vmatpush.msrb.mxu1 %v620_v50  ;;  %v686_v38 = vld [vmem:[#allocation2 + $0x348] sm:$0xff] }
 0x180   :  { %908 = vmatpush.msrb.mxu3 %v743_v39  ;;  %930 = vmatpush.msrb.mxu0 %v586_v51  ;;  %v646_v50 = vld [vmem:[#allocation2 + $0x208] sm:$0xff]  ;;  %v680_v51 = vld [vmem:[#allocation2 + $0x318] sm:$0xff] }
 0x181   :  { %953 = vmatpush.msrb.mxu1 %v618_v52  ;;  %v724_v52 = vld [vmem:[#allocation2 + $0x478] sm:$0xff] }
 0x182   :  { %909 = vmatpush.msrb.mxu3 %v741_v42  ;;  %931 = vmatpush.msrb.mxu0 %v584_v53  ;;  %v650_v42 = vld [vmem:[#allocation2 + $0x228] sm:$0xff]  ;;  %v756_v53 = vld [vmem:[#allocation2 + $0x578] sm:$0xff] }
 0x183   :  { %954 = vmatpush.msrb.mxu1 %v616_v54  ;;  %v678_v54 = vld [vmem:[#allocation2 + $0x308] sm:$0xff] }
 0x184   :  { %932 = vmatpush.msrb.mxu0 %v582_v55  ;;  %v722_v55 = vld [vmem:[#allocation2 + $0x468] sm:$0xff] }
 0x185   :  { %955 = vmatpush.msrb.mxu1 %v614_v56  ;;  %v754_v56 = vld [vmem:[#allocation2 + $0x568] sm:$0xff] }
 0x1b3   :  { %v1454_v58 = vpop.f32.mrf.mxu0 }
 0x1b4   :  { %795 = vmatmul.f32.vlgmr.msra.gmra.mxu2 %v1454_v58 }
 0x1b5   :  { %963 = vmatpush.msra.mxu2 %v676_v57  ;;  %v720_v57 = vld [vmem:[#allocation2 + $0x458] sm:$0xff] }
 0x1b7   :  { %v1457_v62 = vpop.f32.mrf.mxu1  ;;  %964 = vmatpush.msra.mxu2 %v674_v59  ;;  %v752_v59 = vld [vmem:[#allocation2 + $0x558] sm:$0xff] }
 0x1b8   :  { %818 = vmatmul.f32.vlgmr.msra.gmra.mxu3 %v1457_v62 }
 0x1b9   :  { %986 = vmatpush.msra.mxu3 %v708_v60  ;;  %v1460_v1 = vpop.f32.mrf.mxu2  ;;  %965 = vmatpush.msra.mxu2 %v672_v61  ;;  %v750_v60 = vld [vmem:[#allocation2 + $0x548] sm:$0xff]  ;;  %v716_v61 = vld [vmem:[#allocation2 + $0x438] sm:$0xff] }
 0x1ba   :  { %v1462_v2 = vpop.f32.mrf.mxu3 }
 0x1bb   :  { %987 = vmatpush.msra.mxu3 %v706_v63  ;;  %966 = vmatpush.msra.mxu2 %v670_v0  ;;  %v714_v63 = vld [vmem:[#allocation2 + $0x428] sm:$0xff] }
 0x1bc   :  { %798 = vmatmul.f32.gmra.mxu2 %v1460_v1  ;;  %v746_v0 = vld [vmem:[#allocation2 + $0x528] sm:$0xff] }
 0x1bd   :  { %988 = vmatpush.msra.mxu3 %v704_v3  ;;  %967 = vmatpush.msra.mxu2 %v668_v4  ;;  %v712_v3 = vld [vmem:[#allocation2 + $0x418] sm:$0xff] }
 0x1be   :  { %v1466_v11 = vpop.f32.mrf.mxu0  ;;  %v744_v4 = vld [vmem:[#allocation2 + $0x518] sm:$0xff] }
 0x1bf   :  { %989 = vmatpush.msra.mxu3 %v702_v5  ;;  %968 = vmatpush.msra.mxu2 %v666_v6  ;;  %v1474_v19 = vpop.f32.mrf.mxu1  ;;  %v710_v5 = vld [vmem:[#allocation2 + $0x408] sm:$0xff] }
 0x1c0   :  { %821 = vmatmul.f32.gmra.mxu3 %v1462_v2  ;;  %v742_v6 = vld [vmem:[#allocation2 + $0x508] sm:$0xff] }
 0x1c1   :  { %990 = vmatpush.msra.mxu3 %v700_v7  ;;  %969 = vmatpush.msra.mxu2 %v664_v8 }
 0x1c3   :  { %v1468_v14 = vpop.f32.mrf.mxu2  ;;  %v1470_v15 = vpop.f32.mrf.mxu3  ;;  %991 = vmatpush.msra.mxu3 %v698_v9  ;;  %970 = vmatpush.msra.mxu2 %v662_v10 }
 0x1c4   :  { %841 = vmatmul.f32.vlgmr.msra.gmra.mxu0 %v1468_v14  ;;  %864 = vmatmul.f32.vlgmr.msra.gmra.mxu1 %v1470_v15 }
 0x1c5   :  { %992 = vmatpush.msra.mxu3 %v696_v12  ;;  %1009 = vmatpush.msra.mxu0 %v740_v13 }
 0x1c6   :  { %887 = vmatmul.f32.vlgmr.msrb.gmra.mxu2 %v1466_v11  ;;  %1032 = vmatpush.msra.mxu1 %v772_v16  ;;  %v1484_v35 = vpop.f32.mrf.mxu0 }
 0x1c7   :  { %971 = vmatpush.msra.mxu2 %v660_v17  ;;  %993 = vmatpush.msra.mxu3 %v694_v18  ;;  %v1486_v39 = vpop.f32.mrf.mxu1 }
 0x1c8   :  { %1010 = vmatpush.msra.mxu0 %v738_v20  ;;  %910 = vmatmul.f32.vlgmr.msrb.gmra.mxu3 %v1474_v19 }
 0x1c9   :  { %1033 = vmatpush.msra.mxu1 %v770_v21  ;;  %972 = vmatpush.msra.mxu2 %v658_v22 }
 0x1ca   :  { %994 = vmatpush.msra.mxu3 %v692_v23  ;;  %1011 = vmatpush.msra.mxu0 %v736_v24 }
 0x1cb   :  { %1034 = vmatpush.msra.mxu1 %v768_v25  ;;  %v1478_v29 = vpop.f32.mrf.mxu2  ;;  %v1480_v30 = vpop.f32.mrf.mxu3  ;;  %973 = vmatpush.msra.mxu2 %v656_v26 }
 0x1cc   :  { %995 = vmatpush.msra.mxu3 %v690_v27  ;;  %1012 = vmatpush.msra.mxu0 %v734_v28 }
 0x1cd   :  { %844 = vmatmul.f32.gmra.mxu0 %v1478_v29  ;;  %867 = vmatmul.f32.gmra.mxu1 %v1480_v30 }
 0x1ce   :  { %1035 = vmatpush.msra.mxu1 %v766_v31  ;;  %974 = vmatpush.msra.mxu2 %v654_v32 }
 0x1cf   :  { %996 = vmatpush.msra.mxu3 %v688_v33  ;;  %1013 = vmatpush.msra.mxu0 %v732_v34 }
 0x1d0   :  { %890 = vmatmul.f32.gmra.mxu2 %v1484_v35  ;;  %1036 = vmatpush.msra.mxu1 %v764_v36 }
 0x1d1   :  { %975 = vmatpush.msra.mxu2 %v652_v37  ;;  %997 = vmatpush.msra.mxu3 %v686_v38 }
 0x1d2   :  { %1014 = vmatpush.msra.mxu0 %v730_v40  ;;  %913 = vmatmul.f32.gmra.mxu3 %v1486_v39 }
 0x1d3   :  { %1037 = vmatpush.msra.mxu1 %v762_v41  ;;  %976 = vmatpush.msra.mxu2 %v650_v42 }
 0x1d4   :  { %998 = vmatpush.msra.mxu3 %v684_v43  ;;  %1015 = vmatpush.msra.mxu0 %v728_v44 }
 0x1d5   :  { %1038 = vmatpush.msra.mxu1 %v760_v45  ;;  %977 = vmatpush.msra.mxu2 %v648_v46 }
 0x1d6   :  { %999 = vmatpush.msra.mxu3 %v682_v47  ;;  %1016 = vmatpush.msra.mxu0 %v726_v48 }
 0x1d7   :  { %933 = vmatmul.f32.vlgmr.msrb.gmra.mxu0 %v1454_v58  ;;  %956 = vmatmul.f32.vlgmr.msrb.gmra.mxu1 %v1457_v62  ;;  %v718_v58 = vld [vmem:[#allocation2 + $0x448] sm:$0xff]  ;;  %v748_v62 = vld [vmem:[#allocation2 + $0x538] sm:$0xff] }
 0x1d8   :  { %1039 = vmatpush.msra.mxu1 %v758_v49  ;;  %978 = vmatpush.msra.mxu2 %v646_v50 }
 0x1d9   :  { %1000 = vmatpush.msra.mxu3 %v680_v51  ;;  %1017 = vmatpush.msra.mxu0 %v724_v52 }
 0x1da   :  { %979 = vmatmul.f32.vlgmr.msra.gmra.mxu2 %v1468_v14  ;;  %1040 = vmatpush.msra.mxu1 %v756_v53 }
 0x1db   :  { %1001 = vmatpush.msra.mxu3 %v678_v54  ;;  %1018 = vmatpush.msra.mxu0 %v722_v55 }
 0x1dc   :  { %1002 = vmatmul.f32.vlgmr.msra.gmra.mxu3 %v1470_v15  ;;  %1041 = vmatpush.msra.mxu1 %v754_v56 }
 0x1dd   :  { %1019 = vmatpush.msra.mxu0 %v720_v57 }
 0x1de   :  { %1042 = vmatpush.msra.mxu1 %v752_v59 }
 0x1df   :  { %1020 = vmatpush.msra.mxu0 %v718_v58  ;;  %959 = vmatmul.f32.gmra.mxu1 %v1462_v2 }
 0x1e0   :  { %936 = vmatmul.f32.gmra.mxu0 %v1460_v1  ;;  %1043 = vmatpush.msra.mxu1 %v750_v60  ;;  %v773_v1 = vld [vmem:[%s1523_s6] sm:$0x3] }
 0x1e1   :  { %1021 = vmatpush.msra.mxu0 %v716_v61  ;;  %v775_v7 = vperm.slane %v773_v1, 0  ;;  %v776_v33 = vperm.slane %v773_v1, 1 }
 0x1e2   :  { %982 = vmatmul.f32.gmra.mxu2 %v1478_v29  ;;  %1044 = vmatpush.msra.mxu1 %v748_v62 }
 0x1e3   :  { %1022 = vmatpush.msra.mxu0 %v714_v63 }
 0x1e4   :  { %1005 = vmatmul.f32.gmra.mxu3 %v1480_v30  ;;  %1045 = vmatpush.msra.mxu1 %v746_v0 }
 0x1e5   :  { %1023 = vmatpush.msra.mxu0 %v712_v3 }
 0x1e6   :  { %1046 = vmatpush.msra.mxu1 %v744_v4 }
 0x1e7   :  { %1024 = vmatpush.msra.mxu0 %v710_v5 }
 0x1e8   :  { %1025 = vmatmul.f32.vlgmr.msra.gmra.mxu0 %v1466_v11  ;;  %1047 = vmatpush.msra.mxu1 %v742_v6 }
 0x1e9   :  { %1048 = vmatmul.f32.vlgmr.msra.gmra.mxu1 %v1474_v19 }
 0x1f0   :  { %1028 = vmatmul.f32.gmra.mxu0 %v1484_v35 }
 0x1f1   :  { %1051 = vmatmul.f32.gmra.mxu1 %v1486_v39 }
 0x237   :  { %v796_v2 = vpop.f32.mrf.mxu2 }
 0x238   :  { %v797_v9 = vadd.f32 %v796_v2, %v775_v7 }
 0x23b   :  { %v819_v8 = vpop.f32.mrf.mxu3 }
 0x23c   :  { %v820_v12 = vadd.f32 %v819_v8, %v797_v9 }
 0x23f   :  { %v799_v10 = vpop.f32.mrf.mxu2 }
 0x240   :  { %v800_v16 = vadd.f32 %v799_v10, %v775_v7 }
 0x241   :  { %v842_v13 = vpop.f32.mrf.mxu0  ;;  %v865_v14 = vpop.f32.mrf.mxu1 }
 0x242   :  { %v843_v15 = vadd.f32 %v842_v13, %v820_v12 }
 0x243   :  { %v822_v11 = vpop.f32.mrf.mxu3 }
 0x244   :  { %v866_v17 = vadd.f32 %v865_v14, %v843_v15  ;;  %v823_v23 = vadd.f32 %v822_v11, %v800_v16 }
 0x249   :  { %v888_v18 = vpop.f32.mrf.mxu2 }
 0x24a   :  { %v845_v19 = vpop.f32.mrf.mxu0  ;;  %v868_v20 = vpop.f32.mrf.mxu1  ;;  %v889_v21 = vadd.f32 %v888_v18, %v866_v17 }
 0x24b   :  { %v911_v22 = vpop.f32.mrf.mxu3  ;;  %v846_v25 = vadd.f32 %v845_v19, %v823_v23 }
 0x24c   :  { %v912_v24 = vadd.f32 %v911_v22, %v889_v21 }
 0x24d   :  { %v869_v27 = vadd.f32 %v868_v20, %v846_v25 }
 0x24e   :  { %v1055_v26 = vmax.f32 %v912_v24, 0.0 }
 0x250   :  { %1059 = vst [vmem:[%s1524_s7] sm:$0xff] %v1055_v26 }
 0x253   :  { %v891_v28 = vpop.f32.mrf.mxu2 }
 0x254   :  { %v892_v29 = vadd.f32 %v891_v28, %v869_v27  ;;  %v934_v30 = vpop.f32.mrf.mxu0  ;;  %v957_v31 = vpop.f32.mrf.mxu1 }
 0x255   :  { %v914_v32 = vpop.f32.mrf.mxu3  ;;  %v935_v36 = vadd.f32 %v934_v30, %v776_v33 }
 0x256   :  { %v915_v34 = vadd.f32 %v914_v32, %v892_v29 }
 0x257   :  { %v958_v40 = vadd.f32 %v957_v31, %v935_v36 }
 0x258   :  { %v1057_v35 = vmax.f32 %v915_v34, 0.0 }
 0x25a   :  { %1061 = vst [vmem:[%s1524_s7 + $0x10] sm:$0xff] %v1057_v35 }
 0x25c   :  { %v960_v37 = vpop.f32.mrf.mxu1 }
 0x25d   :  { %v937_v38 = vpop.f32.mrf.mxu0  ;;  %v980_v39 = vpop.f32.mrf.mxu2 }
 0x25e   :  { %v981_v41 = vadd.f32 %v980_v39, %v958_v40  ;;  %v938_v43 = vadd.f32 %v937_v38, %v776_v33 }
 0x25f   :  { %v1003_v42 = vpop.f32.mrf.mxu3 }
 0x260   :  { %v1004_v44 = vadd.f32 %v1003_v42, %v981_v41  ;;  %v961_v47 = vadd.f32 %v960_v37, %v938_v43 }
 0x265   :  { %v983_v45 = vpop.f32.mrf.mxu2  ;;  %v1026_v46 = vpop.f32.mrf.mxu0 }
 0x266   :  { %v1027_v48 = vadd.f32 %v1026_v46, %v1004_v44  ;;  %v1049_v49 = vpop.f32.mrf.mxu1  ;;  %v984_v50 = vadd.f32 %v983_v45, %v961_v47 }
 0x267   :  { %v1006_v53 = vpop.f32.mrf.mxu3 }
 0x268   :  { %v1050_v51 = vadd.f32 %v1049_v49, %v1027_v48  ;;  %v1007_v54 = vadd.f32 %v1006_v53, %v984_v50 }
 0x26a   :  { %v1056_v52 = vmax.f32 %v1050_v51, 0.0 }
 0x26c   :  { %1060 = vst [vmem:[%s1524_s7 + $0x8] sm:$0xff] %v1056_v52 }
 0x26d   :  { %v1029_v55 = vpop.f32.mrf.mxu0 }
 0x26e   :  { %v1030_v56 = vadd.f32 %v1029_v55, %v1007_v54  ;;  %v1052_v57 = vpop.f32.mrf.mxu1 }
 0x270   :  { %v1053_v59 = vadd.f32 %v1052_v57, %v1030_v56 }
 0x272   :  { %v1058_v58 = vmax.f32 %v1053_v59, 0.0 }
 0x274   :  { %1062 = vst [vmem:[%s1524_s7 + $0x18] sm:$0xff] %v1058_v58 }
 0x275   :  { %1067 = vsyncpa [#allocation3], 1 }

</bundles_post_ra>
